<compile_context>
chip_gen: v5e
topology: v5e:2x2
jax: 0.10.0
libtpu: 0.0.40
codegen_flags: <defaults>
</compile_context>

<pallas_src>
import jax
import jax.numpy as jnp
from jax.experimental import pallas as pl
from jax.experimental.pallas import tpu as pltpu


_MAX_PARALLEL_DMAS = 4          # a handful of concurrent DMA streams is plenty
_MIN_CHUNK_BYTES = 1 << 20      # don't bother splitting copies under ~1 MiB/chunk


def _plan_chunks(shape, itemsize):
    """Static (offset, size) slices along axis 0, or [None] for a whole-array copy."""
    if not shape or shape[0] < 2:
        return [None]
    total_bytes = itemsize
    for d in shape:
        total_bytes *= int(d)
    k = min(_MAX_PARALLEL_DMAS, int(shape[0]),
            max(1, total_bytes // _MIN_CHUNK_BYTES))
    if k <= 1:
        return [None]
    base, rem = divmod(int(shape[0]), k)
    chunks, off = [], 0
    for i in range(k):
        size = base + (1 if i < rem else 0)
        chunks.append((off, size))
        off += size
    return chunks


def _make_identity_kernel(chunks):
    """Build a kernel issuing one HBM->HBM DMA per static chunk (start all, then wait all)."""

    def kernel(x_hbm, o_hbm, sem):
        copies = []
        for i, chunk in enumerate(chunks):
            if chunk is None:
                src, dst = x_hbm, o_hbm
            else:
                off, size = chunk
                src = x_hbm.at[pl.ds(off, size)]
                dst = o_hbm.at[pl.ds(off, size)]
            cp = pltpu.make_async_copy(src, dst, sem.at[i])
            cp.start()
            copies.append(cp)
        for cp in copies:
            cp.wait()

    return kernel


def identity_layer(x):
    """Pallas-backed identity: returns a fresh tensor equal to x (same shape/dtype)."""
    if x.size == 0:
        # Nothing to copy; launching a kernel for zero elements is pointless.
        return x

    itemsize = jnp.dtype(x.dtype).itemsize
    chunks = _plan_chunks(x.shape, itemsize)

    return pl.pallas_call(
        _make_identity_kernel(chunks),
        out_shape=jax.ShapeDtypeStruct(x.shape, x.dtype),
        # Raw HBM refs on both sides: no VMEM staging, no tiling constraints,
        # no padding — the DMA engines copy the array in place in HBM layout.
        in_specs=[pl.BlockSpec(memory_space=pl.ANY)],
        out_specs=pl.BlockSpec(memory_space=pl.ANY),
        scratch_shapes=[pltpu.SemaphoreType.DMA((len(chunks),))],
        compiler_params=pltpu.CompilerParams(has_side_effects=True),
    )(x)


if __name__ == "__main__":
    key = jax.random.PRNGKey(0)
    # Small NCHW-style input consistent with a generic forward pass.
    x = jax.random.normal(key, (2, 4, 16, 16), dtype=jnp.float32)

    y = identity_layer(x)
    jax.block_until_ready(y)

    assert y.shape == x.shape, f"shape mismatch: {y.shape} vs {x.shape}"
    assert y.dtype == x.dtype, f"dtype mismatch: {y.dtype} vs {x.dtype}"
    assert bool(jnp.all(y == x)), "identity output differs from input"

    print("KERNEL_OK")
</pallas_src>

<mosaic_0001>
module attributes {stable_mosaic.version = 11 : i64} {
  func.func @kernel(%arg0: memref<2x4x16x16xf32, #tpu.memory_space<any>>, %arg1: memref<2x4x16x16xf32, #tpu.memory_space<any>>, %arg2: memref<1x!tpu.dma_semaphore, #tpu.memory_space<semaphore_mem>>) attributes {dimension_semantics = [], scalar_prefetch = 0 : i64, scratch_operands = 1 : i64, tpu.core_type = #tpu.core_type<tc>} {
    %c0_i32 = arith.constant 0 : i32
    %0 = tpu.memref_slice %arg2[%c0_i32] : memref<1x!tpu.dma_semaphore, #tpu.memory_space<semaphore_mem>> -> memref<1x!tpu.dma_semaphore, #tpu.memory_space<semaphore_mem>>
    %1 = tpu.memref_squeeze %0 : memref<1x!tpu.dma_semaphore, #tpu.memory_space<semaphore_mem>> -> memref<!tpu.dma_semaphore, #tpu.memory_space<semaphore_mem>>
    tpu.enqueue_dma source(%arg0 : memref<2x4x16x16xf32, #tpu.memory_space<any>>) target(%arg1 : memref<2x4x16x16xf32, #tpu.memory_space<any>>) target_semaphore(%1 : memref<!tpu.dma_semaphore, #tpu.memory_space<semaphore_mem>>)
    %c0_i32_0 = arith.constant 0 : i32
    %2 = tpu.memref_slice %arg2[%c0_i32_0] : memref<1x!tpu.dma_semaphore, #tpu.memory_space<semaphore_mem>> -> memref<1x!tpu.dma_semaphore, #tpu.memory_space<semaphore_mem>>
    %3 = tpu.memref_squeeze %2 : memref<1x!tpu.dma_semaphore, #tpu.memory_space<semaphore_mem>> -> memref<!tpu.dma_semaphore, #tpu.memory_space<semaphore_mem>>
    tpu.wait_dma2 semaphore(%3 : memref<!tpu.dma_semaphore, #tpu.memory_space<semaphore_mem>>) src(%arg0 : memref<2x4x16x16xf32, #tpu.memory_space<any>>) dst(%arg1 : memref<2x4x16x16xf32, #tpu.memory_space<any>>)
    return
  }
}

</mosaic_0001>

<bundles_post_ra>
// kernel: tpu_custom_call.1
= control target key start
LH: loop header
LB: loop body
LE: loop exit
PB: predicated region body
PF: predicated region fallthrough
CT: control target
= control target key end

     0   :  { %s34_s12 = smov [#allocation2]   ;;  %s35_s13 = smov [#allocation3]   ;;  %s53_s0 = inlined_call_operand.hbm [shape: f32[2,4,16,16], index: 0, kind: input, shape index: {}]   ;;  %s54_s1 = inlined_call_operand.hbm [shape: f32[2,4,16,16], index: 1, kind: output, shape index: {}]  }
   0x1   :  { %s10_s8 = sshll.u32 %s53_s0, 4  ;;  %s12_s11 = sshll.u32 %s54_s1, 4  ;;  %s11_s8 = int_to_ptr.hbm [resolvable:$true] %s10_s8  ;;  %s13_s11 = int_to_ptr.hbm [resolvable:$true] %s12_s11 }
   0x2   :  { %s36_s14 = smov 0  }
   0x3   :  { %16 = dma.general %s11_s8, 2048, %s13_s11, %s34_s12, %s35_s13, [#allocation4], %s36_s14, 0  }
   0x4   :  { %32 = dma.done.wait [#allocation2], 2048 }
   0x5   :  { %33 = vsyncadd [#allocation2], 4294965248 }
   0x6   :  { %22 = vsyncmov [#allocation2] }
   0x9   :  { %s23_s15 = vpop.sfrf %22 }
   0xa   :  { %p28_p0 = scmp.ne.s32.totalorder %s23_s15, 0 }
   0xc   :  { %27 = shalt.err (%p28_p0)  }

</bundles_post_ra>
